<compile_context>
chip_gen: v7x
topology: tpu7x:2x2x1
jax: 0.10.0
libtpu: 0.0.40
codegen_flags: <defaults>
</compile_context>

<pallas_src>
import functools
import math

import jax
import jax.numpy as jnp
from jax.experimental import pallas as pl
from jax.experimental.pallas import tpu as pltpu


def _round_up(x, m):
    return ((x + m - 1) // m) * m


def _prompt_attn_kernel(x_ref, kctx_ref, vctx_ref, wqkv_ref, wfc_ref, o_ref, *, eps):
    """Last-token prompt attention for one row tile.

    x_ref    : (tm, H)  f32   varying (seq-embedding) prompt token rows
    kctx_ref : (4, H)   f32   K of the 4 constant ctx tokens (precomputed)
    vctx_ref : (4, H)   f32   V of the 4 constant ctx tokens (precomputed)
    wqkv_ref : (H, 3H)  bf16  [W_Q^T / sqrt(d_k) | W_K^T | W_V^T]
    wfc_ref  : (H, H)   bf16  W_fc^T
    o_ref    : (tm, H)  f32
    """
    x = x_ref[...]                       # f32 copy kept for residual / LayerNorm
    h = x.shape[-1]

    # Fused Q/K/V projection of the varying token: one lane-dense MXU matmul
    # (bf16 inputs, f32 accumulation).
    qkv = jnp.dot(x.astype(wqkv_ref.dtype), wqkv_ref[...],
                  preferred_element_type=jnp.float32)            # (tm, 3H)
    q = qkv[:, :h]                       # already scaled by 1/sqrt(d_k)
    k = qkv[:, h:2 * h]
    v = qkv[:, 2 * h:]

    k_ctx = kctx_ref[...]                # (4, H)
    v_ctx = vctx_ref[...]                # (4, H)

    # Scores of the last token against [4 ctx tokens, itself].
    s_ctx = jnp.einsum("mh,jh->mj", q, k_ctx,
                       preferred_element_type=jnp.float32)       # (tm, 4)
    s_self = jnp.sum(q * k, axis=-1, keepdims=True)              # (tm, 1)

    # Numerically-stable softmax over the 5 logits.
    m = jnp.maximum(jnp.max(s_ctx, axis=-1, keepdims=True), s_self)
    p_ctx = jnp.exp(s_ctx - m)
    p_self = jnp.exp(s_self - m)
    denom = jnp.sum(p_ctx, axis=-1, keepdims=True) + p_self
    inv = pl.reciprocal(denom, approx=True)                      # EUP slot, ~free

    # context = attn @ V (only the last attention row is needed).
    ctx = jnp.dot(p_ctx, v_ctx, preferred_element_type=jnp.float32)
    ctx = (ctx + p_self * v) * inv                               # (tm, H) f32

    # Output projection, residual, LayerNorm (gamma=1, beta=0, eps=1e-5).
    out = jnp.dot(ctx.astype(wfc_ref.dtype), wfc_ref[...],
                  preferred_element_type=jnp.float32)
    y = out + x
    mu = jnp.mean(y, axis=-1, keepdims=True)
    yc = y - mu
    var = jnp.mean(yc * yc, axis=-1, keepdims=True)
    o_ref[...] = (yc * jax.lax.rsqrt(var + eps)).astype(o_ref.dtype)


def prompt_attention_pallas(x, k_ctx, v_ctx, w_qkv, w_fc, *, tm):
    """x: (Mp, H) f32 -> (Mp, H) f32 (last-token prompt attention)."""
    Mp, H = x.shape
    assert Mp % tm == 0

    flops = 2 * Mp * H * (3 * H + H + 9)            # qkv + fc matmuls + scores + attn@V
    transcendentals = 7 * Mp                        # 5 exp + reciprocal + rsqrt per row
    bytes_accessed = (
        2 * Mp * H * 4                              # x in + out
        + w_qkv.size * w_qkv.dtype.itemsize
        + w_fc.size * w_fc.dtype.itemsize
        + (k_ctx.size + v_ctx.size) * 4
    )

    kernel = functools.partial(_prompt_attn_kernel, eps=1e-5)
    return pl.pallas_call(
        kernel,
        out_shape=jax.ShapeDtypeStruct((Mp, H), jnp.float32),
        grid=(Mp // tm,),
        in_specs=[
            pl.BlockSpec((tm, H), lambda i: (i, 0)),       # varying token rows
            pl.BlockSpec((4, H), lambda i: (0, 0)),        # K_ctx (VMEM resident)
            pl.BlockSpec((4, H), lambda i: (0, 0)),        # V_ctx (VMEM resident)
            pl.BlockSpec((H, 3 * H), lambda i: (0, 0)),    # fused QKV weight
            pl.BlockSpec((H, H), lambda i: (0, 0)),        # fc weight
        ],
        out_specs=pl.BlockSpec((tm, H), lambda i: (i, 0)),
        compiler_params=pltpu.CompilerParams(
            dimension_semantics=("parallel",),
            vmem_limit_bytes=64 * 1024 * 1024,
        ),
        cost_estimate=pl.CostEstimate(
            flops=int(flops),
            transcendentals=int(transcendentals),
            bytes_accessed=int(bytes_accessed),
        ),
    )(x, k_ctx, v_ctx, w_qkv, w_fc)


def init_params(key, item_num, maxlen, hidden):
    ks = jax.random.split(key, 8)
    s = 0.02
    return {
        "src_emb": s * jax.random.normal(ks[0], (item_num + 1, hidden), jnp.float32),
        "pos_emb": s * jax.random.normal(ks[1], (maxlen, hidden), jnp.float32),
        "ctx_E": s * jax.random.normal(ks[2], (2, hidden), jnp.float32),
        "ctx_S_E": s * jax.random.normal(ks[3], (2, hidden), jnp.float32),
        # PyTorch nn.Linear weight shape: [out_features, in_features]
        "wq": s * jax.random.normal(ks[4], (hidden, hidden), jnp.float32),
        "wk": s * jax.random.normal(ks[5], (hidden, hidden), jnp.float32),
        "wv": s * jax.random.normal(ks[6], (hidden, hidden), jnp.float32),
        "wfc": s * jax.random.normal(ks[7], (hidden, hidden), jnp.float32),
    }


def prompt_learner_forward(params, seq, *, dk, tm_max=256, matmul_dtype=jnp.bfloat16):
    """seq: (B, L) int32 item ids -> (B, L, H) float32 prompts."""
    B, L = seq.shape
    H = params["src_emb"].shape[1]

    # Embedding lookups + positional embedding (plain JAX glue).
    seq_feat = params["src_emb"][seq] + params["pos_emb"][jnp.arange(L)][None, :, :]
    # TODO(synk): emb_dropout is treated as eval-mode identity (no RNG in kernel).

    # K/V of the 4 constant ctx prompt tokens are input-independent -> hoist
    # these two tiny (4,H) projections out of the kernel entirely.
    ctx = jnp.concatenate([params["ctx_S_E"], params["ctx_E"]], axis=0)   # (4, H)
    k_ctx = (ctx @ params["wk"].T).astype(jnp.float32)
    v_ctx = (ctx @ params["wv"].T).astype(jnp.float32)

    # Fused pre-transposed QKV weight; fold the 1/sqrt(d_k) score scale into W_Q.
    scale = 1.0 / math.sqrt(dk)
    w_qkv = jnp.concatenate(
        [params["wq"].T * scale, params["wk"].T, params["wv"].T], axis=1
    ).astype(matmul_dtype)                                                # (H, 3H)
    w_fc = params["wfc"].T.astype(matmul_dtype)                           # (H, H)

    # Tile the varying token rows; pad rows to a multiple of the row tile.
    M = B * L
    x = seq_feat.reshape(M, H).astype(jnp.float32)
    tm = min(tm_max, _round_up(M, 8))
    Mp = _round_up(M, tm)
    if Mp != M:
        x = jnp.pad(x, ((0, Mp - M), (0, 0)))

    out = prompt_attention_pallas(x, k_ctx, v_ctx, w_qkv, w_fc, tm=tm)
    return out[:M].reshape(B, L, H)


def _reference(params, seq, *, dk):
    """Pure-JAX f32 reference of the full PyTorch module (all 5 tokens)."""
    B, L = seq.shape
    H = params["src_emb"].shape[1]
    seq_feat = params["src_emb"][seq] + params["pos_emb"][jnp.arange(L)][None]
    ctx = jnp.concatenate([params["ctx_S_E"], params["ctx_E"]], axis=0)   # (4, H)
    prompts = jnp.concatenate(
        [jnp.broadcast_to(ctx[None, None], (B, L, 4, H)), seq_feat[:, :, None, :]],
        axis=2)                                                            # (B,L,5,H)
    q = prompts @ params["wq"].T
    k = prompts @ params["wk"].T
    v = prompts @ params["wv"].T
    s = jnp.einsum("blnd,blkd->blnk", q, k) / math.sqrt(dk)
    a = jax.nn.softmax(s, axis=-1)
    c = jnp.einsum("blnk,blkd->blnd", a, v)
    o = c @ params["wfc"].T
    y = o + prompts
    mu = jnp.mean(y, axis=-1, keepdims=True)
    var = jnp.mean((y - mu) ** 2, axis=-1, keepdims=True)
    yn = (y - mu) * jax.lax.rsqrt(var + 1e-5)
    return yn[:, :, -1, :]                                                 # last token


if __name__ == "__main__":
    B, L, H = 2, 8, 32
    item_num, maxlen, d_k = 20, 8, 16

    key = jax.random.PRNGKey(0)
    kp, ks1, ks2 = jax.random.split(key, 3)
    params = init_params(kp, item_num, maxlen, H)

    seq = jax.random.randint(ks1, (B, L), 0, item_num + 1, dtype=jnp.int32)
    out = jax.block_until_ready(prompt_learner_forward(params, seq, dk=d_k))
    ref = jax.block_until_ready(_reference(params, seq, dk=d_k))
    assert out.shape == (B, L, H)
    assert bool(jnp.all(jnp.isfinite(out)))
    assert jnp.allclose(out, ref, atol=1e-2, rtol=1e-2), (
        f"kernel/reference mismatch: max abs err={jnp.max(jnp.abs(out - ref))}")

    # Second shape exercises the row-padding path (M = 21 -> padded to 24).
    seq2 = jax.random.randint(ks2, (3, 7), 0, item_num + 1, dtype=jnp.int32)
    out2 = jax.block_until_ready(prompt_learner_forward(params, seq2, dk=d_k))
    ref2 = jax.block_until_ready(_reference(params, seq2, dk=d_k))
    assert jnp.allclose(out2, ref2, atol=1e-2, rtol=1e-2), (
        f"padded-path mismatch: max abs err={jnp.max(jnp.abs(out2 - ref2))}")

    print("KERNEL_OK")
</pallas_src>

<mosaic_0001>
module attributes {stable_mosaic.version = 11 : i64} {
  func.func @_prompt_attn_kernel(%arg0: i32, %arg1: memref<16x32xf32, #tpu.memory_space<vmem>>, %arg2: memref<4x32xf32, #tpu.memory_space<vmem>>, %arg3: memref<4x32xf32, #tpu.memory_space<vmem>>, %arg4: memref<32x96xbf16, #tpu.memory_space<vmem>>, %arg5: memref<32x32xbf16, #tpu.memory_space<vmem>>, %arg6: memref<16x32xf32, #tpu.memory_space<vmem>>) attributes {dimension_semantics = [#tpu.dimension_semantics<parallel>], iteration_bounds = array<i64: 1>, scalar_prefetch = 0 : i64, scratch_operands = 0 : i64, tpu.core_type = #tpu.core_type<tc>, window_params = [{transform_indices = @transform_0, window_bounds = array<i64: 16, 32>}, {pipeline_mode = #tpu.pipeline_mode<synchronous>, transform_indices = @transform_1, window_bounds = array<i64: 4, 32>}, {pipeline_mode = #tpu.pipeline_mode<synchronous>, transform_indices = @transform_2, window_bounds = array<i64: 4, 32>}, {pipeline_mode = #tpu.pipeline_mode<synchronous>, transform_indices = @transform_3, window_bounds = array<i64: 32, 96>}, {pipeline_mode = #tpu.pipeline_mode<synchronous>, transform_indices = @transform_4, window_bounds = array<i64: 32, 32>}, {transform_indices = @transform_5, window_bounds = array<i64: 16, 32>}]} {
    %c0 = arith.constant 0 : index
    %c0_0 = arith.constant 0 : index
    %0 = vector.load %arg1[%c0, %c0_0] : memref<16x32xf32, #tpu.memory_space<vmem>>, vector<16x32xf32>
    %1 = arith.truncf %0 : vector<16x32xf32> to vector<16x32xbf16>
    %c0_1 = arith.constant 0 : index
    %c0_2 = arith.constant 0 : index
    %2 = vector.load %arg4[%c0_1, %c0_2] : memref<32x96xbf16, #tpu.memory_space<vmem>>, vector<32x96xbf16>
    %cst = arith.constant dense<0.000000e+00> : vector<16x96xf32>
    %3 = tpu.matmul %1, %2, %cst {dimension_numbers = #tpu.dot_dimension_numbers<[1], [0], [0], [1], [0, 0, 1, 1], [], []>} : vector<16x32xbf16>, vector<32x96xbf16>, vector<16x96xf32> -> vector<16x96xf32>
    %4 = vector.extract_strided_slice %3 {offsets = [0, 0], sizes = [16, 32], strides = [1, 1]} : vector<16x96xf32> to vector<16x32xf32>
    %5 = vector.extract_strided_slice %3 {offsets = [0, 32], sizes = [16, 32], strides = [1, 1]} : vector<16x96xf32> to vector<16x32xf32>
    %6 = vector.extract_strided_slice %3 {offsets = [0, 64], sizes = [16, 32], strides = [1, 1]} : vector<16x96xf32> to vector<16x32xf32>
    %c0_3 = arith.constant 0 : index
    %c0_4 = arith.constant 0 : index
    %7 = vector.load %arg2[%c0_3, %c0_4] : memref<4x32xf32, #tpu.memory_space<vmem>>, vector<4x32xf32>
    %c0_5 = arith.constant 0 : index
    %c0_6 = arith.constant 0 : index
    %8 = vector.load %arg3[%c0_5, %c0_6] : memref<4x32xf32, #tpu.memory_space<vmem>>, vector<4x32xf32>
    "tpu.trace_start"() <{level = 10 : i32, message = "mh,jh->mj"}> : () -> ()
    %cst_7 = arith.constant dense<0.000000e+00> : vector<16x4xf32>
    %9 = tpu.matmul %4, %7, %cst_7 {dimension_numbers = #tpu.dot_dimension_numbers<[1], [1], [0], [0], [0, 0, 1, 0], [], []>} : vector<16x32xf32>, vector<4x32xf32>, vector<16x4xf32> -> vector<16x4xf32>
    "tpu.trace_stop"() : () -> ()
    %10 = arith.mulf %4, %5 : vector<16x32xf32>
    %cst_8 = arith.constant dense<0.000000e+00> : vector<16xf32>
    %11 = vector.multi_reduction <add>, %10, %cst_8 [1] : vector<16x32xf32> to vector<16xf32>
    %12 = vector.shape_cast %11 : vector<16xf32> to vector<16x1xf32>
    %cst_9 = arith.constant dense<0xFF800000> : vector<16xf32>
    %13 = vector.multi_reduction <maximumf>, %9, %cst_9 [1] : vector<16x4xf32> to vector<16xf32>
    %14 = vector.shape_cast %13 : vector<16xf32> to vector<16x1xf32>
    %15 = arith.maximumf %14, %12 : vector<16x1xf32>
    %16 = vector.broadcast %15 : vector<16x1xf32> to vector<16x4xf32>
    %17 = arith.subf %9, %16 : vector<16x4xf32>
    %18 = math.exp %17 : vector<16x4xf32>
    %19 = arith.subf %12, %15 : vector<16x1xf32>
    %20 = math.exp %19 : vector<16x1xf32>
    %cst_10 = arith.constant dense<0.000000e+00> : vector<16xf32>
    %21 = vector.multi_reduction <add>, %18, %cst_10 [1] : vector<16x4xf32> to vector<16xf32>
    %22 = vector.shape_cast %21 : vector<16xf32> to vector<16x1xf32>
    %23 = arith.addf %22, %20 : vector<16x1xf32>
    %24 = tpu.reciprocal %23 {approx = true} : vector<16x1xf32> -> vector<16x1xf32>
    %cst_11 = arith.constant dense<0.000000e+00> : vector<16x32xf32>
    %25 = tpu.matmul %18, %8, %cst_11 {dimension_numbers = #tpu.dot_dimension_numbers<[1], [0], [0], [1], [0, 0, 1, 1], [], []>} : vector<16x4xf32>, vector<4x32xf32>, vector<16x32xf32> -> vector<16x32xf32>
    %26 = vector.broadcast %20 : vector<16x1xf32> to vector<16x32xf32>
    %27 = arith.mulf %26, %6 : vector<16x32xf32>
    %28 = arith.addf %25, %27 : vector<16x32xf32>
    %29 = vector.broadcast %24 : vector<16x1xf32> to vector<16x32xf32>
    %30 = arith.mulf %28, %29 : vector<16x32xf32>
    %31 = arith.truncf %30 : vector<16x32xf32> to vector<16x32xbf16>
    %c0_12 = arith.constant 0 : index
    %c0_13 = arith.constant 0 : index
    %32 = vector.load %arg5[%c0_12, %c0_13] : memref<32x32xbf16, #tpu.memory_space<vmem>>, vector<32x32xbf16>
    %cst_14 = arith.constant dense<0.000000e+00> : vector<16x32xf32>
    %33 = tpu.matmul %31, %32, %cst_14 {dimension_numbers = #tpu.dot_dimension_numbers<[1], [0], [0], [1], [0, 0, 1, 1], [], []>} : vector<16x32xbf16>, vector<32x32xbf16>, vector<16x32xf32> -> vector<16x32xf32>
    %34 = arith.addf %33, %0 : vector<16x32xf32>
    %cst_15 = arith.constant dense<0.000000e+00> : vector<16xf32>
    %35 = vector.multi_reduction <add>, %34, %cst_15 [1] : vector<16x32xf32> to vector<16xf32>
    %36 = vector.shape_cast %35 : vector<16xf32> to vector<16x1xf32>
    %cst_16 = arith.constant 3.200000e+01 : f32
    %37 = vector.broadcast %cst_16 : f32 to vector<16x1xf32>
    %38 = arith.divf %36, %37 : vector<16x1xf32>
    %39 = vector.broadcast %38 : vector<16x1xf32> to vector<16x32xf32>
    %40 = arith.subf %34, %39 : vector<16x32xf32>
    %41 = arith.mulf %40, %40 : vector<16x32xf32>
    %cst_17 = arith.constant dense<0.000000e+00> : vector<16xf32>
    %42 = vector.multi_reduction <add>, %41, %cst_17 [1] : vector<16x32xf32> to vector<16xf32>
    %43 = vector.shape_cast %42 : vector<16xf32> to vector<16x1xf32>
    %cst_18 = arith.constant 3.200000e+01 : f32
    %44 = vector.broadcast %cst_18 : f32 to vector<16x1xf32>
    %45 = arith.divf %43, %44 : vector<16x1xf32>
    %cst_19 = arith.constant 9.99999974E-6 : f32
    %46 = vector.broadcast %cst_19 : f32 to vector<16x1xf32>
    %47 = arith.addf %45, %46 : vector<16x1xf32>
    %48 = math.rsqrt %47 : vector<16x1xf32>
    %49 = vector.broadcast %48 : vector<16x1xf32> to vector<16x32xf32>
    %50 = arith.mulf %40, %49 : vector<16x32xf32>
    %c0_20 = arith.constant 0 : index
    %c0_21 = arith.constant 0 : index
    %51 = vector.load %arg6[%c0_20, %c0_21] : memref<16x32xf32, #tpu.memory_space<vmem>>, vector<16x32xf32>
    tpu.vector_store %arg6[%c0_20, %c0_21], %50 {strides = array<i32>} : memref<16x32xf32, #tpu.memory_space<vmem>>, vector<16x32xf32>,
    return
  }
  func.func @transform_0(%arg0: i32) -> (i32, i32) {
    %c0_i32 = arith.constant 0 : i32
    %c0_i32_0 = arith.constant 0 : i32
    return %arg0, %c0_i32 : i32, i32
  }
  func.func @transform_1(%arg0: i32) -> (i32, i32) {
    %c0_i32 = arith.constant 0 : i32
    %c0_i32_0 = arith.constant 0 : i32
    %c0_i32_1 = arith.constant 0 : i32
    return %c0_i32, %c0_i32_0 : i32, i32
  }
  func.func @transform_2(%arg0: i32) -> (i32, i32) {
    %c0_i32 = arith.constant 0 : i32
    %c0_i32_0 = arith.constant 0 : i32
    %c0_i32_1 = arith.constant 0 : i32
    return %c0_i32, %c0_i32_0 : i32, i32
  }
  func.func @transform_3(%arg0: i32) -> (i32, i32) {
    %c0_i32 = arith.constant 0 : i32
    %c0_i32_0 = arith.constant 0 : i32
    %c0_i32_1 = arith.constant 0 : i32
    return %c0_i32, %c0_i32_0 : i32, i32
  }
  func.func @transform_4(%arg0: i32) -> (i32, i32) {
    %c0_i32 = arith.constant 0 : i32
    %c0_i32_0 = arith.constant 0 : i32
    %c0_i32_1 = arith.constant 0 : i32
    return %c0_i32, %c0_i32_0 : i32, i32
  }
  func.func @transform_5(%arg0: i32) -> (i32, i32) {
    %c0_i32 = arith.constant 0 : i32
    %c0_i32_0 = arith.constant 0 : i32
    return %arg0, %c0_i32 : i32, i32
  }
}

</mosaic_0001>

<bundles_post_ra>
// kernel: tpu_custom_call.1
= control target key start
LH: loop header
LB: loop body
LE: loop exit
PB: predicated region body
PF: predicated region fallthrough
CT: control target
= control target key end

     0   :  { %10 = vsyncpa [#allocation3], 0  ;;  %s882_s0 = inlined_call_operand.hbm [shape: f32[16,32], index: 0, kind: input, shape index: {}]   ;;  %s883_s1 = inlined_call_operand.hbm [shape: f32[4,32], index: 1, kind: input, shape index: {}]   ;;  %s884_s2 = inlined_call_operand.hbm [shape: f32[4,32], index: 2, kind: input, shape index: {}]   ;;  %s885_s3 = inlined_call_operand.hbm [shape: bf16[32,96], index: 3, kind: input, shape index: {}]   ;;  %s886_s4 = inlined_call_operand.hbm [shape: bf16[32,32], index: 4, kind: input, shape index: {}]   ;;  %s887_s5 = inlined_call_operand.hbm [shape: f32[16,32], index: 5, kind: output, shape index: {}]  }
   0x1   :  { %11 = vsyncpa [#allocation6], 0 }
   0x2   :  { %12 = vsyncpa [#allocation9], 0 }
   0x3   :  { %13 = vsyncpa [#allocation4], 0  ;;  %s710_s18 = smov [#allocation5]   ;;  %s711_s20 = smov [#allocation8]  }
   0x4   :  { %s32_s19 = sshll.u32 %s710_s18, 4  ;;  %s51_s21 = sshll.u32 %s711_s20, 4  ;;  %s33_s19 = int_to_ptr.vmem [resolvable:$true] %s32_s19  ;;  %s753_s21 = int_to_ptr.vmem [resolvable:$true] %s51_s21 }
   0x5   :  { %s570_s24 = scalar_lea.hbm %s883_s1, 64 }
   0x6   :  { %p571_p0 = scmp.ne.s32.totalorder %s883_s1, %s570_s24  ;;  %p574_p1 = scmp.lt.u32.totalorder %s570_s24, %s883_s1 }
   0x8   :  { %p576_p2 = pnand %p574_p1, %p571_p0 }
   0xa   :  { %579 = shalt.err (!%p576_p2)
}
   0xb   :  { %s580_s29 = scalar_lea.vmem %s33_s19, 64  ;;  %p585_p4 = scmp.lt.s32.totalorder %s33_s19, %s33_s19 }
   0xc   :  { %p581_p3 = scmp.ne.s32.totalorder %s33_s19, %s580_s29  ;;  %p586_p5 = scmp.lt.s32.totalorder %s580_s29, %s580_s29 }
   0xe   :  { %p587_p6 = por %p586_p5, %p585_p4 }
  0x10   :  { %p588_p7 = pnand %p587_p6, %p581_p3 }
  0x12   :  { %591 = shalt.err (!%p588_p7)
}
  0x13   :  { %35 = dma.hbm_to_vmem [thread:$0]  %s883_s1, 64, %s33_s19, [#allocation6]  }
  0x14   :  { %s592_s9 = scalar_lea.hbm %s885_s3, 256 }
  0x15   :  { %p593_p8 = scmp.ne.s32.totalorder %s885_s3, %s592_s9  ;;  %p596_p9 = scmp.lt.u32.totalorder %s592_s9, %s885_s3 }
  0x17   :  { %p598_p10 = pnand %p596_p9, %p593_p8 }
  0x19   :  { %601 = shalt.err (!%p598_p10)
}
  0x1a   :  { %s602_s14 = scalar_lea.vmem %s753_s21, 256  ;;  %p607_p12 = scmp.lt.s32.totalorder %s753_s21, %s753_s21 }
  0x1b   :  { %p603_p11 = scmp.ne.s32.totalorder %s753_s21, %s602_s14  ;;  %p608_p13 = scmp.lt.s32.totalorder %s602_s14, %s602_s14 }
  0x1d   :  { %p609_p0 = por %p608_p13, %p607_p12 }
  0x1f   :  { %p610_p1 = pnand %p609_p0, %p603_p11 }
  0x21   :  { %613 = shalt.err (!%p610_p1)
}
  0x22   :  { %s712_s1 = smov 64   ;;  %s713_s15 = smov 4  }
  0x23   :  { %57 = dma.hbm_to_vmem [thread:$0]  %s885_s3, 256, %s753_s21, [#allocation9], %s712_s1, %s712_s1, %s713_s15  }
  0x24   :  { %s714_s18 = smov [#allocation2]   ;;  %s614_s23 = scalar_lea.hbm %s882_s0, 256 }
  0x25   :  { %s19_s19 = sshll.u32 %s714_s18, 4  ;;  %p615_p2 = scmp.ne.s32.totalorder %s882_s0, %s614_s23  ;;  %s20_s19 = int_to_ptr.vmem [resolvable:$true] %s19_s19 }
  0x26   :  { %p618_p3 = scmp.lt.u32.totalorder %s614_s23, %s882_s0 }
  0x28   :  { %p620_p4 = pnand %p618_p3, %p615_p2 }
  0x2a   :  { %623 = shalt.err (!%p620_p4)
}
  0x2b   :  { %s624_s28 = scalar_lea.vmem %s20_s19, 256  ;;  %p629_p6 = scmp.lt.s32.totalorder %s20_s19, %s20_s19 }
  0x2c   :  { %p625_p5 = scmp.ne.s32.totalorder %s20_s19, %s624_s28  ;;  %p630_p7 = scmp.lt.s32.totalorder %s624_s28, %s624_s28 }
  0x2e   :  { %p631_p8 = por %p630_p7, %p629_p6 }
  0x30   :  { %p632_p9 = pnand %p631_p8, %p625_p5 }
  0x32   :  { %635 = shalt.err (!%p632_p9)
}
  0x33   :  { %s715_s3 = smov 128   ;;  %s716_s21 = smov 8  }
  0x34   :  { %25 = dma.hbm_to_vmem [thread:$0]  %s882_s0, 256, %s20_s19, [#allocation3], %s715_s3, %s715_s3, %s716_s21  }
  0x35   :  { %s717_s6 = smov [#allocation7]   ;;  %s718_s8 = smov [#allocation10]  }
  0x36   :  { %s42_s7 = sshll.u32 %s717_s6, 4  ;;  %s63_s9 = sshll.u32 %s718_s8, 4  ;;  %s43_s7 = int_to_ptr.vmem [resolvable:$true] %s42_s7  ;;  %s64_s9 = int_to_ptr.vmem [resolvable:$true] %s63_s9 }
  0x37   :  { %s636_s12 = scalar_lea.hbm %s884_s2, 64 }
  0x38   :  { %p637_p10 = scmp.ne.s32.totalorder %s884_s2, %s636_s12  ;;  %p640_p11 = scmp.lt.u32.totalorder %s636_s12, %s884_s2 }
  0x3a   :  { %p642_p12 = pnand %p640_p11, %p637_p10 }
  0x3c   :  { %645 = shalt.err (!%p642_p12)
}
  0x3d   :  { %s646_s0 = scalar_lea.vmem %s43_s7, 64  ;;  %p651_p0 = scmp.lt.s32.totalorder %s43_s7, %s43_s7 }
  0x3e   :  { %p647_p13 = scmp.ne.s32.totalorder %s43_s7, %s646_s0  ;;  %p652_p1 = scmp.lt.s32.totalorder %s646_s0, %s646_s0 }
  0x40   :  { %p653_p2 = por %p652_p1, %p651_p0 }
  0x42   :  { %p654_p3 = pnand %p653_p2, %p647_p13 }
  0x44   :  { %657 = shalt.err (!%p654_p3)
}
  0x45   :  { %45 = dma.hbm_to_vmem [thread:$0]  %s884_s2, 64, %s43_s7, [#allocation6]  }
  0x46   :  { %s658_s23 = scalar_lea.hbm %s886_s4, 256 }
  0x47   :  { %p659_p4 = scmp.ne.s32.totalorder %s886_s4, %s658_s23  ;;  %p662_p5 = scmp.lt.u32.totalorder %s658_s23, %s886_s4 }
  0x49   :  { %p664_p6 = pnand %p662_p5, %p659_p4 }
  0x4b   :  { %667 = shalt.err (!%p664_p6)
}
  0x4c   :  { %s668_s28 = scalar_lea.vmem %s64_s9, 256  ;;  %p673_p8 = scmp.lt.s32.totalorder %s64_s9, %s64_s9 }
  0x4d   :  { %p669_p7 = scmp.ne.s32.totalorder %s64_s9, %s668_s28  ;;  %p674_p9 = scmp.lt.s32.totalorder %s668_s28, %s668_s28 }
  0x4f   :  { %p675_p10 = por %p674_p9, %p673_p8 }
  0x51   :  { %p676_p11 = pnand %p675_p10, %p669_p7 }
  0x53   :  { %679 = shalt.err (!%p676_p11)
}
  0x54   :  { %69 = dma.hbm_to_vmem [thread:$0]  %s886_s4, 256, %s64_s9, [#allocation9], %s712_s1, %s712_s1, %s713_s15  }
  0x55   :  { %702 = dma.done.wait [#allocation3], 256  }
  0x56   :  { %703 = vsyncadd [#allocation3], 4294967040 }
  0x57   :  { %704 = dma.done.wait [#allocation6], 128  }
  0x58   :  { %705 = vsyncadd [#allocation6], 4294967168 }
  0x59   :  { %706 = dma.done.wait [#allocation9], 512  }
  0x5a   :  { %707 = vsyncadd [#allocation9], 4294966784  ;;  %v719_v0 = vmov 0.0   ;;  %vm720_vm0 = vmmov 0   ;;  %v550_v1 = vld [vmem:[#allocation8] sm:$0xff]   ;;  %v551_v2 = vld [vmem:[#allocation8 + $0x8] sm:$0xff]  }
  0x5b   :  { %511 = vmatprep.subr.bf16.mxu0 %v719_v0  ;;  %515 = vmatprep.mubr.msk.bf16.mxu0 %vm720_vm0, %v719_v0  ;;  %v832_v3 = vld [vmem:[#allocation2] sm:$0xff]  ;;  %v834_v4 = vld [vmem:[#allocation2 + $0x8] sm:$0xff]  ;;  %vm105_vm1 = vcmask 261120   ;;  %v150_v5 = vld [vmem:[#allocation5] sm:$0xf]  ;;  %s721_s4 = smov 96  }
  0x5c   :  { %512 = vmatpush3.bf16.msra.mxu0 %v550_v1  ;;  %519 = vmatprep.subr.msk.mxu1 %vm105_vm1, %v150_v5  ;;  %v88_v6 = vpack.c.bf16 %v834_v4, %v832_v3  ;;  %vm250_vm2 = vcmask 31744   ;;  %v151_v21 = vld [vmem:[#allocation7] sm:$0xf]  ;;  %vm297_vm3 = vcmask 1043456   ;;  %v552_v44 = vld [vmem:[#allocation10] sm:$0xff]  }
  0x5d   :  { %513 = vmatprep.subr.bf16.mxu0 %v719_v0  ;;  %520 = vmatpush3.xpose.msk.msra.mxu1 %vm105_vm1, %v150_v5  ;;  %v553_v45 = vld [vmem:[#allocation10 + $0x8] sm:$0xff]  }
  0x5e   :  { %524 = vmatprep.subr.msk.mxu1 %vm297_vm3, %v151_v21 }
  0x60   :  { %514 = vmatpush3.bf16.msra.mxu0 %v551_v2 }
  0x61   :  { %529 = vmatprep.subr.bf16.mxu0 %v719_v0 }
  0x63   :  { %516 = vmatmul.mubr.msk.bf16.vlgmr.msra.gmra.mrb[0].mxu0 %vm105_vm1, %v88_v6 }
  0x64   :  { %533 = vmatprep.mubr.msk.bf16.mxu0 %vm720_vm0, %v719_v0  ;;  %530 = vmatpush3.bf16.msra.mxu0 %v552_v44 }
  0x65   :  { %531 = vmatprep.subr.bf16.mxu0 %v719_v0 }
  0x68   :  { %532 = vmatpush3.bf16.msra.mxu0 %v553_v45 }
 0x136   :  { %v143_v7 = vpop.f32.mrb[0].mxu0 }
 0x137   :  { %236 = vrot.lane.b32.xlu0 %v143_v7, %s721_s4  ;;  %v517_v8 = vpop.f32.mrb[1].mxu0  ;;  %521 = vmatprep.mubr.msk.f32.mxu1 %vm105_vm1, %v143_v7 }
 0x138   :  { %v146_v9 = vpop.f32.mrb[2].mxu0 }
 0x139   :  { %v518_v10 = vpop.f32.mrb[3].mxu0  ;;  %522 = vmatmul.mubr.msk.f32.vlgmr.msra.gmra.mrb[0].mxu1 %vm105_vm1, %v146_v9 }
 0x13a   :  { %525 = vmatpush3.msk.msra.mxu1 %vm297_vm3, %v151_v21 }
 0x13b   :  { %238 = vrot.lane.b32.xlu0 %v146_v9, %s721_s4 }
 0x1a9   :  { %v237_v11 = vpop.permute.xlu0 %236 }
 0x1aa   :  { %v242_v12 = vmul.f32 %v237_v11, %v143_v7 }
 0x1ac   :  { %v244_v13 = vsel %vm105_vm1, %v242_v12, 0.0 }
 0x1ad   :  { %245 = vadd.xlane.f32.xlu1 %v244_v13  ;;  %v239_v14 = vpop.permute.xlu0 %238 }
 0x1ae   :  { %v243_v15 = vmul.f32 %v239_v14, %v146_v9 }
 0x1b0   :  { %v247_v16 = vsel %vm105_vm1, %v243_v15, 0.0 }
 0x1b1   :  { %248 = vadd.xlane.f32.xlu0 %v247_v16 }
 0x20c   :  { %v523_v17 = vpop.f32.mrb[0].mxu1 }
 0x20d   :  { %v227_v18 = vpop.f32.mrb[1].mxu1  ;;  %v254_v20 = vsel %vm250_vm2, %v523_v17, -inf }
 0x20e   :  { %v251_v19 = vsel %vm250_vm2, %v227_v18, -inf }
 0x20f   :  { %252 = vmax.xlane.f32.xlu1 %v251_v19 }
 0x213   :  { %255 = vmax.xlane.f32.xlu1 %v254_v20 }
 0x23a   :  { %v246_v22 = vpop.xlane.xlu1 %245 }
 0x23e   :  { %v249_v26 = vpop.xlane.xlu0 %248 }
 0x29c   :  { %v253_v23 = vpop.xlane.xlu1 %252 }
 0x29d   :  { %v257_v24 = vmax.f32 %v253_v23, %v246_v22 }
 0x29f   :  { %v259_v25 = vsub.f32 %v227_v18, %v257_v24  ;;  %v265_v34 = vsub.f32 %v246_v22, %v257_v24 }
 0x2a0   :  { %v256_v27 = vpop.xlane.xlu1 %255 }
 0x2a1   :  { %v261_v28 = vmul.f32 1.442695, %v259_v25  ;;  %v258_v29 = vmax.f32 %v256_v27, %v249_v26  ;;  %v267_v36 = vmul.f32 1.442695, %v265_v34 }
 0x2a3   :  { %554 = vpow2.f32 %v261_v28  ;;  %v260_v30 = vsub.f32 %v523_v17, %v258_v29  ;;  %v266_v37 = vsub.f32 %v249_v26, %v258_v29 }
 0x2a5   :  { %v263_v31 = vmul.f32 1.442695, %v260_v30  ;;  %v269_v39 = vmul.f32 1.442695, %v266_v37 }
 0x2a7   :  { %556 = vpow2.f32 %v263_v31 }
 0x2a8   :  { %558 = vpow2.f32 %v267_v36 }
 0x2a9   :  { %560 = vpow2.f32 %v269_v39 }
 0x2ad   :  { %v555_v32 = vpop.eup %554 }
 0x2ae   :  { %526 = vmatprep.mubr.msk.f32.mxu1 %vm250_vm2, %v555_v32  ;;  %v271_v38 = vsel %vm250_vm2, %v555_v32, 0.0 }
 0x2b1   :  { %v557_v33 = vpop.eup %556 }
 0x2b2   :  { %527 = vmatmul.mubr.msk.f32.vlgmr.msra.gmra.mrb[2].mxu1 %vm250_vm2, %v557_v33  ;;  %v274_v35 = vsel %vm250_vm2, %v557_v33, 0.0  ;;  %v559_v40 = vpop.eup %558 }
 0x2b3   :  { %275 = vadd.xlane.f32.xlu1 %v274_v35  ;;  %v281_v41 = vmul.f32 %v559_v40, %v143_v7  ;;  %v561_v42 = vpop.eup %560 }
 0x2b4   :  { %v282_v43 = vmul.f32 %v561_v42, %v146_v9 }
 0x2b7   :  { %272 = vadd.xlane.f32.xlu1 %v271_v38 }
 0x2c8   :  { %285 = vrot.lane.b32.xlu1 %v281_v41, %s712_s1 }
 0x2cc   :  { %287 = vrot.lane.b32.xlu1 %v282_v43, %s712_s1  ;;  %s722_s1 = smov [#allocation11]  }
 0x2cd   :  { %s473_s15 = sshll.u32 %s722_s1, 4  ;;  %s474_s15 = int_to_ptr.vmem [resolvable:$true] %s473_s15 }
 0x2ce   :  { %s680_s30 = scalar_lea.vmem %s474_s15, 256  ;;  %p685_p13 = scmp.lt.s32.totalorder %s474_s15, %s474_s15 }
 0x2cf   :  { %p681_p12 = scmp.ne.s32.totalorder %s474_s15, %s680_s30  ;;  %p686_p0 = scmp.lt.s32.totalorder %s680_s30, %s680_s30 }
 0x2d1   :  { %p687_p1 = por %p686_p0, %p685_p13 }
 0x2d3   :  { %p688_p2 = pnand %p687_p1, %p681_p12 }
 0x340   :  { %v276_v46 = vpop.xlane.xlu1 %275 }
 0x341   :  { %v278_v48 = vadd.f32 %v561_v42, %v276_v46 }
 0x343   :  { %562 = vrcp.f32 %v278_v48 }
 0x344   :  { %v273_v47 = vpop.xlane.xlu1 %272 }
 0x345   :  { %v277_v49 = vadd.f32 %v559_v40, %v273_v47 }
 0x347   :  { %564 = vrcp.f32 %v277_v49 }
 0x348   :  { %v286_v50 = vpop.permute.xlu1 %285 }
 0x34c   :  { %v288_v51 = vpop.permute.xlu1 %287 }
 0x34d   :  { %v563_v55 = vpop.eup %562 }
 0x351   :  { %v565_v57 = vpop.eup %564 }
 0x385   :  { %v528_v52 = vpop.f32.mrb[2].mxu1 }
 0x386   :  { %v373_v53 = vadd.f32 %v528_v52, %v288_v51  ;;  %v367_v54 = vpop.f32.mrb[3].mxu1 }
 0x387   :  { %v368_v56 = vadd.f32 %v367_v54, %v286_v50 }
 0x388   :  { %v377_v58 = vmul.f32 %v563_v55, %v373_v53 }
 0x389   :  { %v376_v59 = vmul.f32 %v565_v57, %v368_v56 }
 0x38b   :  { %v378_v60 = vpack.c.bf16 %v377_v58, %v376_v59 }
 0x38d   :  { %534 = vmatmul.mubr.msk.bf16.vlgmr.msra.gmra.mrb[4].mxu0 %vm105_vm1, %v378_v60 }
 0x460   :  { %v432_v61 = vpop.f32.mrb[4].mxu0 }
 0x461   :  { %v433_v62 = vadd.f32 %v432_v61, %v832_v3  ;;  %v535_v63 = vpop.f32.mrb[5].mxu0 }
 0x462   :  { %v435_v0 = vpop.f32.mrb[6].mxu0 }
 0x463   :  { %v436_v1 = vadd.f32 %v435_v0, %v834_v4  ;;  %v536_v2 = vpop.f32.mrb[7].mxu0  ;;  %v439_v5 = vsel %vm105_vm1, %v433_v62, 0.0 }
 0x464   :  { %440 = vadd.xlane.f32.xlu0 %v439_v5 }
 0x465   :  { %v442_v6 = vsel %vm105_vm1, %v436_v1, 0.0 }
 0x466   :  { %443 = vadd.xlane.f32.xlu1 %v442_v6 }
 0x4f1   :  { %v441_v7 = vpop.xlane.xlu0 %440 }
 0x4f2   :  { %v446_v8 = vmul.f32 0.03125, %v441_v7 }
 0x4f3   :  { %v444_v9 = vpop.xlane.xlu1 %443 }
 0x4f4   :  { %v448_v10 = vsub.f32 %v433_v62, %v446_v8  ;;  %v447_v11 = vmul.f32 0.03125, %v444_v9 }
 0x4f6   :  { %v449_v12 = vsub.f32 %v436_v1, %v447_v11  ;;  %v450_v13 = vmul.f32 %v448_v10, %v448_v10 }
 0x4f8   :  { %v452_v3 = vsel %vm105_vm1, %v450_v13, 0.0  ;;  %v451_v14 = vmul.f32 %v449_v12, %v449_v12 }
 0x4f9   :  { %453 = vadd.xlane.f32.xlu0 %v452_v3 }
 0x4fa   :  { %v455_v4 = vsel %vm105_vm1, %v451_v14, 0.0 }
 0x4fd   :  { %456 = vadd.xlane.f32.xlu0 %v455_v4 }
 0x586   :  { %v454_v15 = vpop.xlane.xlu0 %453 }
 0x587   :  { %v458_v16 = vmul.f32 0.03125, %v454_v15 }
 0x589   :  { %v460_v17 = vadd.f32 1e-05, %v458_v16 }
 0x58a   :  { %v457_v18 = vpop.xlane.xlu0 %456 }
 0x58b   :  { %566 = vrsqrt.f32 %v460_v17  ;;  %v459_v19 = vmul.f32 0.03125, %v457_v18 }
 0x58d   :  { %v461_v20 = vadd.f32 1e-05, %v459_v19 }
 0x58f   :  { %568 = vrsqrt.f32 %v461_v20 }
 0x595   :  { %v567_v21 = vpop.eup %566 }
 0x596   :  { %v464_v22 = vmul.f32 %v567_v21, %v448_v10 }
 0x598   :  { %466 = vst.msk [vmem:[#allocation11] sm:$0xff] %vm105_vm1, %v464_v22 }
 0x599   :  { %v569_v23 = vpop.eup %568 }
 0x59a   :  { %v465_v24 = vmul.f32 %v569_v23, %v449_v12 }
 0x59c   :  { %467 = vst.msk [vmem:[#allocation11 + $0x8] sm:$0xff] %vm105_vm1, %v465_v24 }
 0x59d   :  { %691 = shalt.err (!%p688_p2)
}
 0x59e   :  { %s692_s8 = scalar_lea.hbm %s887_s5, 256 }
 0x59f   :  { %p693_p3 = scmp.ne.s32.totalorder %s887_s5, %s692_s8  ;;  %p696_p4 = scmp.lt.u32.totalorder %s692_s8, %s887_s5 }
 0x5a1   :  { %p698_p5 = pnand %p696_p4, %p693_p3 }
 0x5a3   :  { %701 = shalt.err (!%p698_p5)
}
 0x5a4   :  { %479 = dma.vmem_to_hbm [thread:$0]  %s474_s15, 256, %s887_s5, [#allocation4], %s715_s3, %s715_s3, %s716_s21  }
 0x5a5   :  { %708 = dma.done.wait [#allocation4], 256  }
 0x5a6   :  { %709 = vsyncadd [#allocation4], 4294967040 }
 0x5a7   :  { %483 = vsyncpa [#allocation3], 1 }
 0x5a8   :  { %484 = vsyncpa [#allocation6], 1 }
 0x5a9   :  { %485 = vsyncpa [#allocation9], 1 }
 0x5aa   :  { %486 = vsyncpa [#allocation4], 1 }

</bundles_post_ra>
